<compile_context>
chip_gen: v7x
topology: tpu7x:2x2x1
jax: 0.10.0
libtpu: 0.0.40
codegen_flags: <defaults>
</compile_context>

<pallas_src>
import jax
import jax.numpy as jnp
from jax import lax
from jax.experimental import pallas as pl
from jax.experimental.pallas import tpu as pltpu


def _upsample_conv_kernel(x_ref, xup_ref, xdn_ref, w_ref, b_ref, o_ref, xpad_ref):
    # x_ref   : (1, TH, W, Cin)    NHWC input rows for this (batch, row-block)
    # xup_ref : (1, 1, W, Cin)     row just above the block (clamped at image top)
    # xdn_ref : (1, 1, W, Cin)     row just below the block (clamped at image bottom)
    # w_ref   : (3, 3, Cin, Cout)  conv weight, (kh, kw, ci, co)
    # b_ref   : (Cout, 1)          conv bias
    # o_ref   : (1, Cout, TH*W)    channels-major conv output (lane-dense minor dim)
    # xpad_ref: (TH+2, W+2, Cin)   VMEM scratch: zero-padded row slab
    TH = x_ref.shape[1]
    W = x_ref.shape[2]
    Cin = x_ref.shape[3]

    i = pl.program_id(1)
    last = pl.num_programs(1) - 1

    # Left/right zero columns (also covers the four corners).  Rewritten every step:
    # it is tiny, and keeps the kernel correct when the parallel grid is split across
    # TensorCores (each core has its own scratch instance).
    zcol = jnp.zeros((TH + 2, 1, Cin), jnp.float32)
    xpad_ref[:, 0:1, :] = zcol
    xpad_ref[:, W + 1:W + 2, :] = zcol

    # Top halo row: real row from the block above, or zeros at the image border.
    @pl.when(i > 0)
    def _():
        xpad_ref[0:1, 1:W + 1, :] = xup_ref[0]

    @pl.when(i == 0)
    def _():
        xpad_ref[0:1, 1:W + 1, :] = jnp.zeros((1, W, Cin), jnp.float32)

    # Bottom halo row.
    @pl.when(i < last)
    def _():
        xpad_ref[TH + 1:TH + 2, 1:W + 1, :] = xdn_ref[0]

    @pl.when(i == last)
    def _():
        xpad_ref[TH + 1:TH + 2, 1:W + 1, :] = jnp.zeros((1, W, Cin), jnp.float32)

    # Interior <- this row block (zero padding absorbed in VMEM; no HBM-side jnp.pad).
    xpad_ref[1:TH + 1, 1:W + 1, :] = x_ref[0]

    # 3x3 conv as nine accumulated MXU matmuls over statically shifted windows
    # (no im2col patch scratch, no lane-misaligned column stores).
    xp = xpad_ref[...]
    w_all = w_ref[...]
    acc = None
    for kh in range(3):
        for kw in range(3):
            lhs = xp[kh:kh + TH, kw:kw + W, :].reshape(TH * W, Cin)
            part = jnp.dot(lhs, w_all[kh, kw],
                           preferred_element_type=jnp.float32)        # (TH*W, Cout)
            acc = part if acc is None else acc + part

    # Channels-major store: minor dim TH*W is a multiple of 128 -> unmasked vst's.
    o_ref[0] = (acc.T + b_ref[...]).astype(o_ref.dtype)


def _pick_row_block(H, W):
    """Largest TH dividing H whose output tile minor dim (TH*W) stays a multiple of
    128 (unless TH == H), capped so a row tile stays comfortably inside VMEM."""
    best = H
    for th in range(H, 0, -1):
        if H % th != 0:
            continue
        if th != H and (th * W) % 128 != 0:
            continue
        best = th
        if th * W <= 4096:
            break
    return best


def upsample(x_nhwc, w_oihw, b, *, row_block=None):
    """Forward of Upsample: (N, H, W, n_feat) NHWC -> (N, 2H, 2W, n_feat // 2) NHWC."""
    N, H, W, Cin = x_nhwc.shape
    Cout = w_oihw.shape[0]            # = 2 * n_feat
    C2 = Cout // 4                    # PixelShuffle(2) output channels = n_feat // 2

    TH = _pick_row_block(H, W) if row_block is None else int(row_block)
    assert H % TH == 0, "row_block must divide H"
    assert TH == H or (TH * W) % 128 == 0, "row tile must keep TH*W a multiple of 128"
    nH = H // TH

    w_k = jnp.transpose(w_oihw, (2, 3, 1, 0)).astype(jnp.float32)    # (3, 3, Cin, Cout)
    bias = b.reshape(Cout, 1).astype(jnp.float32)
    x = x_nhwc.astype(jnp.float32)

    conv_out = pl.pallas_call(
        _upsample_conv_kernel,
        out_shape=jax.ShapeDtypeStruct((N, Cout, H * W), jnp.float32),
        grid_spec=pltpu.PrefetchScalarGridSpec(
            num_scalar_prefetch=0,
            grid=(N, nH),
            in_specs=[
                # main row block
                pl.BlockSpec((1, TH, W, Cin), lambda n, i: (n, i, 0, 0)),
                # 1-row halo above (row-block size 1 -> block index == row index)
                pl.BlockSpec((1, 1, W, Cin),
                             lambda n, i: (n, jnp.maximum(i * TH - 1, 0), 0, 0)),
                # 1-row halo below
                pl.BlockSpec((1, 1, W, Cin),
                             lambda n, i: (n, jnp.minimum((i + 1) * TH, H - 1), 0, 0)),
                pl.BlockSpec((3, 3, Cin, Cout), lambda n, i: (0, 0, 0, 0)),
                pl.BlockSpec((Cout, 1), lambda n, i: (0, 0)),
            ],
            out_specs=pl.BlockSpec((1, Cout, TH * W), lambda n, i: (n, 0, i)),
            scratch_shapes=[
                pltpu.VMEM((TH + 2, W + 2, Cin), jnp.float32),
            ],
        ),
        compiler_params=pltpu.CompilerParams(
            dimension_semantics=("parallel", "parallel"),
            vmem_limit_bytes=32 * 1024 * 1024,
        ),
    )(x, x, x, w_k, bias)

    # PixelShuffle(2) + final NHWC permute: out[n, 2h+i, 2w+j, c] = y[n, 4c+2i+j, h, w].
    # Pure layout plumbing; one XLA reshape/transpose over the lane-dense kernel output.
    y = conv_out.reshape(N, C2, 2, 2, H, W)
    y = jnp.transpose(y, (0, 4, 2, 5, 3, 1))          # (N, H, 2, W, 2, C2)
    return y.reshape(N, 2 * H, 2 * W, C2)


# ---------------- pure-JAX reference (for correctness check) ----------------
def _reference(x_nhwc, w_oihw, b):
    x = jnp.transpose(x_nhwc, (0, 3, 1, 2))                      # NCHW
    y = lax.conv_general_dilated(
        x, w_oihw, window_strides=(1, 1), padding="SAME",
        dimension_numbers=("NCHW", "OIHW", "NCHW"))
    y = y + b.reshape(1, -1, 1, 1)
    N, C4, H, W = y.shape
    C2 = C4 // 4
    z = y.reshape(N, C2, 2, 2, H, W)
    z = jnp.transpose(z, (0, 1, 4, 2, 5, 3)).reshape(N, C2, 2 * H, 2 * W)
    return jnp.transpose(z, (0, 2, 3, 1))                        # NHWC


if __name__ == "__main__":
    N, n_feat, H, W = 2, 4, 16, 16
    Cout = 2 * n_feat

    key = jax.random.PRNGKey(0)
    k_x, k_w, k_b = jax.random.split(key, 3)
    x = jax.random.normal(k_x, (N, H, W, n_feat), jnp.float32)
    w = jax.random.normal(k_w, (Cout, n_feat, 3, 3), jnp.float32) * 0.1   # OIHW (PyTorch)
    b = jax.random.normal(k_b, (Cout,), jnp.float32) * 0.1

    ref = _reference(x, w, b)

    # Row-tiled path: TH=8 -> grid (N, 2); exercises both real and zero halo rows.
    out_tiled = jax.jit(lambda a, ww, bb: upsample(a, ww, bb, row_block=8))(x, w, b)
    out_tiled = jax.block_until_ready(out_tiled)

    # Auto-picked tile (here TH == H: single row block per image, no halo used).
    out_auto = jax.jit(upsample)(x, w, b)
    out_auto = jax.block_until_ready(out_auto)

    assert out_tiled.shape == (N, 2 * H, 2 * W, n_feat // 2), out_tiled.shape
    err_t = float(jnp.max(jnp.abs(out_tiled - ref)))
    err_a = float(jnp.max(jnp.abs(out_auto - ref)))
    assert err_t < 2e-2, f"tiled max abs error too large: {err_t}"
    assert err_a < 2e-2, f"untiled max abs error too large: {err_a}"

    print("KERNEL_OK")
</pallas_src>

<mosaic_0001>
module attributes {stable_mosaic.version = 11 : i64} {
  func.func @_upsample_conv_kernel(%arg0: i32, %arg1: i32, %arg2: memref<1x8x16x4xf32, #tpu.memory_space<vmem>>, %arg3: memref<1x1x16x4xf32, #tpu.memory_space<vmem>>, %arg4: memref<1x1x16x4xf32, #tpu.memory_space<vmem>>, %arg5: memref<3x3x4x8xf32, #tpu.memory_space<vmem>>, %arg6: memref<8x1xf32, #tpu.memory_space<vmem>>, %arg7: memref<1x8x128xf32, #tpu.memory_space<vmem>>, %arg8: memref<10x18x4xf32, #tpu.memory_space<vmem>>) attributes {dimension_semantics = [#tpu.dimension_semantics<parallel>, #tpu.dimension_semantics<parallel>], iteration_bounds = array<i64: 2, 2>, scalar_prefetch = 0 : i64, scratch_operands = 1 : i64, tpu.core_type = #tpu.core_type<tc>, window_params = [{transform_indices = @transform_0, window_bounds = array<i64: 1, 8, 16, 4>}, {transform_indices = @transform_1, window_bounds = array<i64: 1, 1, 16, 4>}, {transform_indices = @transform_2, window_bounds = array<i64: 1, 1, 16, 4>}, {pipeline_mode = #tpu.pipeline_mode<synchronous>, transform_indices = @transform_3, window_bounds = array<i64: 3, 3, 4, 8>}, {pipeline_mode = #tpu.pipeline_mode<synchronous>, transform_indices = @transform_4, window_bounds = array<i64: 8, 1>}, {transform_indices = @transform_5, window_bounds = array<i64: 1, 8, 128>}]} {
    %cst = arith.constant 0.000000e+00 : f32
    %0 = vector.broadcast %cst : f32 to vector<10x1x4xf32>
    %c0 = arith.constant 0 : index
    %c0_0 = arith.constant 0 : index
    %c0_1 = arith.constant 0 : index
    %1 = vector.load %arg8[%c0, %c0_0, %c0_1] : memref<10x18x4xf32, #tpu.memory_space<vmem>>, vector<10x1x4xf32>
    tpu.vector_store %arg8[%c0, %c0_0, %c0_1], %0 {strides = array<i32>} : memref<10x18x4xf32, #tpu.memory_space<vmem>>, vector<10x1x4xf32>,
    %c0_2 = arith.constant 0 : index
    %c17 = arith.constant 17 : index
    %c0_3 = arith.constant 0 : index
    %2 = vector.load %arg8[%c0_2, %c17, %c0_3] : memref<10x18x4xf32, #tpu.memory_space<vmem>>, vector<10x1x4xf32>
    tpu.vector_store %arg8[%c0_2, %c17, %c0_3], %0 {strides = array<i32>} : memref<10x18x4xf32, #tpu.memory_space<vmem>>, vector<10x1x4xf32>,
    %c0_i32 = arith.constant 0 : i32
    %3 = arith.cmpi sgt, %arg1, %c0_i32 : i32
    %4 = arith.extui %3 : i1 to i32
    %c0_i32_4 = arith.constant 0 : i32
    %5 = arith.cmpi ne, %4, %c0_i32_4 : i32
    scf.if %5 {
      %c0_37 = arith.constant 0 : index
      %c0_38 = arith.constant 0 : index
      %c0_39 = arith.constant 0 : index
      %c0_40 = arith.constant 0 : index
      %80 = vector.load %arg3[%c0_37, %c0_38, %c0_39, %c0_40] : memref<1x1x16x4xf32, #tpu.memory_space<vmem>>, vector<1x1x16x4xf32>
      %81 = vector.shape_cast %80 : vector<1x1x16x4xf32> to vector<1x16x4xf32>
      %c0_41 = arith.constant 0 : index
      %c1_42 = arith.constant 1 : index
      %c0_43 = arith.constant 0 : index
      %82 = vector.load %arg8[%c0_41, %c1_42, %c0_43] : memref<10x18x4xf32, #tpu.memory_space<vmem>>, vector<1x16x4xf32>
      tpu.vector_store %arg8[%c0_41, %c1_42, %c0_43], %81 {strides = array<i32>} : memref<10x18x4xf32, #tpu.memory_space<vmem>>, vector<1x16x4xf32>,
    } else {
    }
    %c0_i32_5 = arith.constant 0 : i32
    %6 = arith.cmpi eq, %arg1, %c0_i32_5 : i32
    %7 = arith.extui %6 : i1 to i32
    %c0_i32_6 = arith.constant 0 : i32
    %8 = arith.cmpi ne, %7, %c0_i32_6 : i32
    scf.if %8 {
      %cst_37 = arith.constant 0.000000e+00 : f32
      %80 = vector.broadcast %cst_37 : f32 to vector<1x16x4xf32>
      %c0_38 = arith.constant 0 : index
      %c1_39 = arith.constant 1 : index
      %c0_40 = arith.constant 0 : index
      %81 = vector.load %arg8[%c0_38, %c1_39, %c0_40] : memref<10x18x4xf32, #tpu.memory_space<vmem>>, vector<1x16x4xf32>
      tpu.vector_store %arg8[%c0_38, %c1_39, %c0_40], %80 {strides = array<i32>} : memref<10x18x4xf32, #tpu.memory_space<vmem>>, vector<1x16x4xf32>,
    } else {
    }
    %c1_i32 = arith.constant 1 : i32
    %9 = arith.cmpi slt, %arg1, %c1_i32 : i32
    %10 = arith.extui %9 : i1 to i32
    %c0_i32_7 = arith.constant 0 : i32
    %11 = arith.cmpi ne, %10, %c0_i32_7 : i32
    scf.if %11 {
      %c0_37 = arith.constant 0 : index
      %c0_38 = arith.constant 0 : index
      %c0_39 = arith.constant 0 : index
      %c0_40 = arith.constant 0 : index
      %80 = vector.load %arg4[%c0_37, %c0_38, %c0_39, %c0_40] : memref<1x1x16x4xf32, #tpu.memory_space<vmem>>, vector<1x1x16x4xf32>
      %81 = vector.shape_cast %80 : vector<1x1x16x4xf32> to vector<1x16x4xf32>
      %c9 = arith.constant 9 : index
      %c1_41 = arith.constant 1 : index
      %c0_42 = arith.constant 0 : index
      %82 = vector.load %arg8[%c9, %c1_41, %c0_42] : memref<10x18x4xf32, #tpu.memory_space<vmem>>, vector<1x16x4xf32>
      tpu.vector_store %arg8[%c9, %c1_41, %c0_42], %81 {strides = array<i32>} : memref<10x18x4xf32, #tpu.memory_space<vmem>>, vector<1x16x4xf32>,
    } else {
    }
    %c1_i32_8 = arith.constant 1 : i32
    %12 = arith.cmpi eq, %arg1, %c1_i32_8 : i32
    %13 = arith.extui %12 : i1 to i32
    %c0_i32_9 = arith.constant 0 : i32
    %14 = arith.cmpi ne, %13, %c0_i32_9 : i32
    scf.if %14 {
      %cst_37 = arith.constant 0.000000e+00 : f32
      %80 = vector.broadcast %cst_37 : f32 to vector<1x16x4xf32>
      %c9 = arith.constant 9 : index
      %c1_38 = arith.constant 1 : index
      %c0_39 = arith.constant 0 : index
      %81 = vector.load %arg8[%c9, %c1_38, %c0_39] : memref<10x18x4xf32, #tpu.memory_space<vmem>>, vector<1x16x4xf32>
      tpu.vector_store %arg8[%c9, %c1_38, %c0_39], %80 {strides = array<i32>} : memref<10x18x4xf32, #tpu.memory_space<vmem>>, vector<1x16x4xf32>,
    } else {
    }
    %c0_10 = arith.constant 0 : index
    %c0_11 = arith.constant 0 : index
    %c0_12 = arith.constant 0 : index
    %c0_13 = arith.constant 0 : index
    %15 = vector.load %arg2[%c0_10, %c0_11, %c0_12, %c0_13] : memref<1x8x16x4xf32, #tpu.memory_space<vmem>>, vector<1x8x16x4xf32>
    %16 = vector.shape_cast %15 : vector<1x8x16x4xf32> to vector<8x16x4xf32>
    %c1 = arith.constant 1 : index
    %c1_14 = arith.constant 1 : index
    %c0_15 = arith.constant 0 : index
    %17 = vector.load %arg8[%c1, %c1_14, %c0_15] : memref<10x18x4xf32, #tpu.memory_space<vmem>>, vector<8x16x4xf32>
    tpu.vector_store %arg8[%c1, %c1_14, %c0_15], %16 {strides = array<i32>} : memref<10x18x4xf32, #tpu.memory_space<vmem>>, vector<8x16x4xf32>,
    %c0_16 = arith.constant 0 : index
    %c0_17 = arith.constant 0 : index
    %c0_18 = arith.constant 0 : index
    %18 = vector.load %arg8[%c0_16, %c0_17, %c0_18] : memref<10x18x4xf32, #tpu.memory_space<vmem>>, vector<10x18x4xf32>
    %c0_19 = arith.constant 0 : index
    %c0_20 = arith.constant 0 : index
    %c0_21 = arith.constant 0 : index
    %c0_22 = arith.constant 0 : index
    %19 = vector.load %arg5[%c0_19, %c0_20, %c0_21, %c0_22] : memref<3x3x4x8xf32, #tpu.memory_space<vmem>>, vector<3x3x4x8xf32>
    %20 = vector.extract_strided_slice %18 {offsets = [0, 0, 0], sizes = [8, 16, 4], strides = [1, 1, 1]} : vector<10x18x4xf32> to vector<8x16x4xf32>
    %21 = vector.shape_cast %20 : vector<8x16x4xf32> to vector<128x4xf32>
    %22 = vector.extract_strided_slice %19 {offsets = [0, 0, 0, 0], sizes = [1, 1, 4, 8], strides = [1, 1, 1, 1]} : vector<3x3x4x8xf32> to vector<1x1x4x8xf32>
    %23 = vector.shape_cast %22 : vector<1x1x4x8xf32> to vector<4x8xf32>
    %cst_23 = arith.constant dense<0.000000e+00> : vector<128x8xf32>
    %24 = tpu.matmul %21, %23, %cst_23 {dimension_numbers = #tpu.dot_dimension_numbers<[1], [0], [0], [1], [0, 0, 1, 1], [], []>} : vector<128x4xf32>, vector<4x8xf32>, vector<128x8xf32> -> vector<128x8xf32>
    %25 = vector.extract_strided_slice %18 {offsets = [0, 1, 0], sizes = [8, 16, 4], strides = [1, 1, 1]} : vector<10x18x4xf32> to vector<8x16x4xf32>
    %26 = vector.shape_cast %25 : vector<8x16x4xf32> to vector<128x4xf32>
    %27 = vector.extract_strided_slice %19 {offsets = [0, 1, 0, 0], sizes = [1, 1, 4, 8], strides = [1, 1, 1, 1]} : vector<3x3x4x8xf32> to vector<1x1x4x8xf32>
    %28 = vector.shape_cast %27 : vector<1x1x4x8xf32> to vector<4x8xf32>
    %cst_24 = arith.constant dense<0.000000e+00> : vector<128x8xf32>
    %29 = tpu.matmul %26, %28, %cst_24 {dimension_numbers = #tpu.dot_dimension_numbers<[1], [0], [0], [1], [0, 0, 1, 1], [], []>} : vector<128x4xf32>, vector<4x8xf32>, vector<128x8xf32> -> vector<128x8xf32>
    %30 = arith.addf %24, %29 : vector<128x8xf32>
    %31 = vector.extract_strided_slice %18 {offsets = [0, 2, 0], sizes = [8, 16, 4], strides = [1, 1, 1]} : vector<10x18x4xf32> to vector<8x16x4xf32>
    %32 = vector.shape_cast %31 : vector<8x16x4xf32> to vector<128x4xf32>
    %33 = vector.extract_strided_slice %19 {offsets = [0, 2, 0, 0], sizes = [1, 1, 4, 8], strides = [1, 1, 1, 1]} : vector<3x3x4x8xf32> to vector<1x1x4x8xf32>
    %34 = vector.shape_cast %33 : vector<1x1x4x8xf32> to vector<4x8xf32>
    %cst_25 = arith.constant dense<0.000000e+00> : vector<128x8xf32>
    %35 = tpu.matmul %32, %34, %cst_25 {dimension_numbers = #tpu.dot_dimension_numbers<[1], [0], [0], [1], [0, 0, 1, 1], [], []>} : vector<128x4xf32>, vector<4x8xf32>, vector<128x8xf32> -> vector<128x8xf32>
    %36 = arith.addf %30, %35 : vector<128x8xf32>
    %37 = vector.extract_strided_slice %18 {offsets = [1, 0, 0], sizes = [8, 16, 4], strides = [1, 1, 1]} : vector<10x18x4xf32> to vector<8x16x4xf32>
    %38 = vector.shape_cast %37 : vector<8x16x4xf32> to vector<128x4xf32>
    %39 = vector.extract_strided_slice %19 {offsets = [1, 0, 0, 0], sizes = [1, 1, 4, 8], strides = [1, 1, 1, 1]} : vector<3x3x4x8xf32> to vector<1x1x4x8xf32>
    %40 = vector.shape_cast %39 : vector<1x1x4x8xf32> to vector<4x8xf32>
    %cst_26 = arith.constant dense<0.000000e+00> : vector<128x8xf32>
    %41 = tpu.matmul %38, %40, %cst_26 {dimension_numbers = #tpu.dot_dimension_numbers<[1], [0], [0], [1], [0, 0, 1, 1], [], []>} : vector<128x4xf32>, vector<4x8xf32>, vector<128x8xf32> -> vector<128x8xf32>
    %42 = arith.addf %36, %41 : vector<128x8xf32>
    %43 = vector.extract_strided_slice %18 {offsets = [1, 1, 0], sizes = [8, 16, 4], strides = [1, 1, 1]} : vector<10x18x4xf32> to vector<8x16x4xf32>
    %44 = vector.shape_cast %43 : vector<8x16x4xf32> to vector<128x4xf32>
    %45 = vector.extract_strided_slice %19 {offsets = [1, 1, 0, 0], sizes = [1, 1, 4, 8], strides = [1, 1, 1, 1]} : vector<3x3x4x8xf32> to vector<1x1x4x8xf32>
    %46 = vector.shape_cast %45 : vector<1x1x4x8xf32> to vector<4x8xf32>
    %cst_27 = arith.constant dense<0.000000e+00> : vector<128x8xf32>
    %47 = tpu.matmul %44, %46, %cst_27 {dimension_numbers = #tpu.dot_dimension_numbers<[1], [0], [0], [1], [0, 0, 1, 1], [], []>} : vector<128x4xf32>, vector<4x8xf32>, vector<128x8xf32> -> vector<128x8xf32>
    %48 = arith.addf %42, %47 : vector<128x8xf32>
    %49 = vector.extract_strided_slice %18 {offsets = [1, 2, 0], sizes = [8, 16, 4], strides = [1, 1, 1]} : vector<10x18x4xf32> to vector<8x16x4xf32>
    %50 = vector.shape_cast %49 : vector<8x16x4xf32> to vector<128x4xf32>
    %51 = vector.extract_strided_slice %19 {offsets = [1, 2, 0, 0], sizes = [1, 1, 4, 8], strides = [1, 1, 1, 1]} : vector<3x3x4x8xf32> to vector<1x1x4x8xf32>
    %52 = vector.shape_cast %51 : vector<1x1x4x8xf32> to vector<4x8xf32>
    %cst_28 = arith.constant dense<0.000000e+00> : vector<128x8xf32>
    %53 = tpu.matmul %50, %52, %cst_28 {dimension_numbers = #tpu.dot_dimension_numbers<[1], [0], [0], [1], [0, 0, 1, 1], [], []>} : vector<128x4xf32>, vector<4x8xf32>, vector<128x8xf32> -> vector<128x8xf32>
    %54 = arith.addf %48, %53 : vector<128x8xf32>
    %55 = vector.extract_strided_slice %18 {offsets = [2, 0, 0], sizes = [8, 16, 4], strides = [1, 1, 1]} : vector<10x18x4xf32> to vector<8x16x4xf32>
    %56 = vector.shape_cast %55 : vector<8x16x4xf32> to vector<128x4xf32>
    %57 = vector.extract_strided_slice %19 {offsets = [2, 0, 0, 0], sizes = [1, 1, 4, 8], strides = [1, 1, 1, 1]} : vector<3x3x4x8xf32> to vector<1x1x4x8xf32>
    %58 = vector.shape_cast %57 : vector<1x1x4x8xf32> to vector<4x8xf32>
    %cst_29 = arith.constant dense<0.000000e+00> : vector<128x8xf32>
    %59 = tpu.matmul %56, %58, %cst_29 {dimension_numbers = #tpu.dot_dimension_numbers<[1], [0], [0], [1], [0, 0, 1, 1], [], []>} : vector<128x4xf32>, vector<4x8xf32>, vector<128x8xf32> -> vector<128x8xf32>
    %60 = arith.addf %54, %59 : vector<128x8xf32>
    %61 = vector.extract_strided_slice %18 {offsets = [2, 1, 0], sizes = [8, 16, 4], strides = [1, 1, 1]} : vector<10x18x4xf32> to vector<8x16x4xf32>
    %62 = vector.shape_cast %61 : vector<8x16x4xf32> to vector<128x4xf32>
    %63 = vector.extract_strided_slice %19 {offsets = [2, 1, 0, 0], sizes = [1, 1, 4, 8], strides = [1, 1, 1, 1]} : vector<3x3x4x8xf32> to vector<1x1x4x8xf32>
    %64 = vector.shape_cast %63 : vector<1x1x4x8xf32> to vector<4x8xf32>
    %cst_30 = arith.constant dense<0.000000e+00> : vector<128x8xf32>
    %65 = tpu.matmul %62, %64, %cst_30 {dimension_numbers = #tpu.dot_dimension_numbers<[1], [0], [0], [1], [0, 0, 1, 1], [], []>} : vector<128x4xf32>, vector<4x8xf32>, vector<128x8xf32> -> vector<128x8xf32>
    %66 = arith.addf %60, %65 : vector<128x8xf32>
    %67 = vector.extract_strided_slice %18 {offsets = [2, 2, 0], sizes = [8, 16, 4], strides = [1, 1, 1]} : vector<10x18x4xf32> to vector<8x16x4xf32>
    %68 = vector.shape_cast %67 : vector<8x16x4xf32> to vector<128x4xf32>
    %69 = vector.extract_strided_slice %19 {offsets = [2, 2, 0, 0], sizes = [1, 1, 4, 8], strides = [1, 1, 1, 1]} : vector<3x3x4x8xf32> to vector<1x1x4x8xf32>
    %70 = vector.shape_cast %69 : vector<1x1x4x8xf32> to vector<4x8xf32>
    %cst_31 = arith.constant dense<0.000000e+00> : vector<128x8xf32>
    %71 = tpu.matmul %68, %70, %cst_31 {dimension_numbers = #tpu.dot_dimension_numbers<[1], [0], [0], [1], [0, 0, 1, 1], [], []>} : vector<128x4xf32>, vector<4x8xf32>, vector<128x8xf32> -> vector<128x8xf32>
    %72 = arith.addf %66, %71 : vector<128x8xf32>
    %73 = tpu.transpose %72, [1, 0] : vector<128x8xf32> -> vector<8x128xf32>
    %c0_32 = arith.constant 0 : index
    %c0_33 = arith.constant 0 : index
    %74 = vector.load %arg6[%c0_32, %c0_33] : memref<8x1xf32, #tpu.memory_space<vmem>>, vector<8x1xf32>
    %75 = vector.broadcast %74 : vector<8x1xf32> to vector<8x128xf32>
    %76 = arith.addf %73, %75 : vector<8x128xf32>
    %c0_34 = arith.constant 0 : index
    %c0_35 = arith.constant 0 : index
    %c0_36 = arith.constant 0 : index
    %77 = vector.load %arg7[%c0_34, %c0_35, %c0_36] : memref<1x8x128xf32, #tpu.memory_space<vmem>>, vector<1x8x128xf32>
    %78 = vector.shape_cast %77 : vector<1x8x128xf32> to vector<8x128xf32>
    %79 = vector.shape_cast %76 : vector<8x128xf32> to vector<1x8x128xf32>
    tpu.vector_store %arg7[%c0_34, %c0_35, %c0_36], %79 {strides = array<i32>} : memref<1x8x128xf32, #tpu.memory_space<vmem>>, vector<1x8x128xf32>,
    return
  }
  func.func @transform_0(%arg0: i32, %arg1: i32) -> (i32, i32, i32, i32) {
    %c0_i32 = arith.constant 0 : i32
    %c0_i32_0 = arith.constant 0 : i32
    %c0_i32_1 = arith.constant 0 : i32
    return %arg0, %arg1, %c0_i32, %c0_i32_0 : i32, i32, i32, i32
  }
  func.func @transform_1(%arg0: i32, %arg1: i32) -> (i32, i32, i32, i32) {
    %c8_i32 = arith.constant 8 : i32
    %0 = arith.muli %arg1, %c8_i32 : i32
    %c1_i32 = arith.constant 1 : i32
    %1 = arith.subi %0, %c1_i32 : i32
    %c0_i32 = arith.constant 0 : i32
    %2 = arith.maxsi %1, %c0_i32 : i32
    %c0_i32_0 = arith.constant 0 : i32
    %c0_i32_1 = arith.constant 0 : i32
    %c0_i32_2 = arith.constant 0 : i32
    return %arg0, %2, %c0_i32_0, %c0_i32_1 : i32, i32, i32, i32
  }
  func.func @transform_2(%arg0: i32, %arg1: i32) -> (i32, i32, i32, i32) {
    %c1_i32 = arith.constant 1 : i32
    %0 = arith.addi %arg1, %c1_i32 : i32
    %c8_i32 = arith.constant 8 : i32
    %1 = arith.muli %0, %c8_i32 : i32
    %c15_i32 = arith.constant 15 : i32
    %2 = arith.minsi %1, %c15_i32 : i32
    %c0_i32 = arith.constant 0 : i32
    %c0_i32_0 = arith.constant 0 : i32
    %c0_i32_1 = arith.constant 0 : i32
    return %arg0, %2, %c0_i32, %c0_i32_0 : i32, i32, i32, i32
  }
  func.func @transform_3(%arg0: i32, %arg1: i32) -> (i32, i32, i32, i32) {
    %c0_i32 = arith.constant 0 : i32
    %c0_i32_0 = arith.constant 0 : i32
    %c0_i32_1 = arith.constant 0 : i32
    %c0_i32_2 = arith.constant 0 : i32
    %c0_i32_3 = arith.constant 0 : i32
    return %c0_i32, %c0_i32_0, %c0_i32_1, %c0_i32_2 : i32, i32, i32, i32
  }
  func.func @transform_4(%arg0: i32, %arg1: i32) -> (i32, i32) {
    %c0_i32 = arith.constant 0 : i32
    %c0_i32_0 = arith.constant 0 : i32
    %c0_i32_1 = arith.constant 0 : i32
    return %c0_i32, %c0_i32_0 : i32, i32
  }
  func.func @transform_5(%arg0: i32, %arg1: i32) -> (i32, i32, i32) {
    %c0_i32 = arith.constant 0 : i32
    %c0_i32_0 = arith.constant 0 : i32
    return %arg0, %c0_i32, %arg1 : i32, i32, i32
  }
}

</mosaic_0001>

<bundles_post_ra>
// kernel: _lambda_.1
= control target key start
LH: loop header
LB: loop body
LE: loop exit
PB: predicated region body
PF: predicated region fallthrough
CT: control target
= control target key end

     0   :  { %s3221_s18 = smov 0   ;;  %s3223_s19 = smov 0   ;;  %s3921_s0 = inlined_call_operand.vmem [shape: f32[2,16,16,4], index: 0, kind: input, shape index: {}, may-alias: {0,1,2}]   ;;  %s3922_s1 = inlined_call_operand.vmem [shape: f32[2,16,16,4], index: 1, kind: input, shape index: {}, may-alias: {0,1,2}]   ;;  %s3923_s2 = inlined_call_operand.vmem [shape: f32[2,16,16,4], index: 2, kind: input, shape index: {}, may-alias: {0,1,2}]   ;;  %s3924_s3 = inlined_call_operand.vmem [shape: f32[3,3,4,8], index: 3, kind: input, shape index: {}]   ;;  %s3925_s4 = inlined_call_operand.vmem [shape: f32[8,1], index: 4, kind: input, shape index: {}]   ;;  %s3926_s5 = inlined_call_operand.vmem [shape: f32[2,8,256], index: 5, kind: output, shape index: {}]  }
   0x1   :  { %3927 = sst [smem:[#allocation5_spill]] %s3921_s0  ;;  %s3225_s20 = smov 0  }
   0x2   :  { %s3227_s21 = smov 0   ;;  %s3229_s22 = smov 0  }
   0x3 LB: > { %s24_s23 = sadd.s32 1, %s3177_s20  ;;  %s27_s24 = sadd.s32 1, %s3181_s21  ;;  %s3185_s22 = sphi %s3229_s22, %s15_s22   ;;  %s3181_s21 = sphi %s3227_s21, %s3936_s21   ;;  %s3177_s20 = sphi %s3225_s20, %s3935_s20   ;;  %s3173_s19 = sphi %s3223_s19, %s3934_s19   ;;  %s3169_s18 = sphi %s3221_s18, %s3933_s18  }
   0x4   : > { %p25_p0 = scmp.ge.s32.totalorder %s24_s23, 2  ;;  %p2394_p1 = scmp.ge.s32.totalorder %s3185_s22, 1 }
   0x5   : > { %p273_p2 = scmp.lt.s32.totalorder %s3185_s22, 5 }
   0x6   : > { %s3938_s23 = smov (%p25_p0, %s24_s23), 0  ;;  %s3940_s24 = smov (!%p25_p0, %s27_s24), %s3181_s21 }
   0x7   : > { %3928 = sst [smem:[#allocation3_spill]] %s3938_s23  ;;  %p274_p3 = pnand %p2394_p1, %p273_p2 }
   0x8   : > { %p29_p4 = scmp.ge.s32.totalorder %s3940_s24, 2  ;;  %s3256_s25 = sshll.u32 (!%p274_p3), %s3169_s18, 3  ;;  %vm388_vm0 = vcmask (!%p274_p3), 24576   ;;  %v3187_v0 = vmov (!%p274_p3), 0.0  }
   0x9   : > { %277 = sbr.rel (%p274_p3) target bundleno = 535 (0x217), region = 40  ;;  %p336_p5 = scmp.lt.s32.totalorder (!%p274_p3), %s3173_s19, 1  ;;  %389 = vst.msk [vmem:[#allocation2] sm:$0x1] (!%p274_p3), %vm388_vm0, %v3187_v0  ;;  %390 = vst.msk [vmem:[#allocation2 + $0x18] sm:$0x1] (!%p274_p3), %vm388_vm0, %v3187_v0 }
   0xa   : > { %s3942_s24 = smov (%p29_p4, %s3940_s24), 0  ;;  %p338_p6 = scmp.lt.s32.totalorder (!%p274_p3), %s3256_s25, 15  ;;  %391 = vst.msk [vmem:[#allocation2 + $0x30] sm:$0x1] (!%p274_p3), %vm388_vm0, %v3187_v0  ;;  %392 = vst.msk [vmem:[#allocation2 + $0x48] sm:$0x1] (!%p274_p3), %vm388_vm0, %v3187_v0 }
   0xb   : > { %3929 = sst [smem:[#allocation4_spill]] %s3942_s24  ;;  %s3261_s26 = sadd.s32 (!%p274_p3), 4294967295, %s3256_s25  ;;  %393 = vst.msk [vmem:[#allocation2 + $0x60] sm:$0x1] (!%p274_p3), %vm388_vm0, %v3187_v0  ;;  %394 = vst.msk [vmem:[#allocation2 + $0x78] sm:$0x1] (!%p274_p3), %vm388_vm0, %v3187_v0 }
   0xc   : > { %395 = vst.msk [vmem:[#allocation2 + $0x90] sm:$0x1] (!%p274_p3), %vm388_vm0, %v3187_v0  ;;  %396 = vst.msk [vmem:[#allocation2 + $0xa8] sm:$0x1] (!%p274_p3), %vm388_vm0, %v3187_v0  ;;  %p348_p7 = scmp.gt.s32.totalorder (!%p274_p3), %s3261_s26, 0  ;;  %p2401_p8 = scmp.lt.s32.totalorder (!%p274_p3), %s3261_s26, 15 }
   0xd   : > { %397 = vst.msk [vmem:[#allocation2 + $0xc0] sm:$0x1] (!%p274_p3), %vm388_vm0, %v3187_v0  ;;  %398 = vst.msk [vmem:[#allocation2 + $0xd8] sm:$0x1] (!%p274_p3), %vm388_vm0, %v3187_v0  ;;  %s2584_s6 = sadd.s32 (!%p274_p3), 8, %s3256_s25  ;;  %s3930_s0 = sld [smem:[#allocation5_spill]] (!%p274_p3) }
   0xe   : > { %399 = vst.msk [vmem:[#allocation2 + $0x11] sm:$0x1] (!%p274_p3), %vm388_vm0, %v3187_v0  ;;  %400 = vst.msk [vmem:[#allocation2 + $0x29] sm:$0x1] (!%p274_p3), %vm388_vm0, %v3187_v0  ;;  %p365_p9 = scmp.lt.s32.totalorder (!%p274_p3), %s2584_s6, 15  ;;  %p382_p10 = scmp.lt.s32.totalorder (!%p274_p3), %s3169_s18, 1 }
   0xf   : > { %401 = vst.msk [vmem:[#allocation2 + $0x41] sm:$0x1] (!%p274_p3), %vm388_vm0, %v3187_v0  ;;  %402 = vst.msk [vmem:[#allocation2 + $0x59] sm:$0x1] (!%p274_p3), %vm388_vm0, %v3187_v0  ;;  %p2418_p11 = scmp.le.s32.totalorder (!%p274_p3), %s3169_s18, 0 }
  0x10   : > { %403 = vst.msk [vmem:[#allocation2 + $0x71] sm:$0x1] %vm388_vm0, %v3187_v0  ;;  %404 = vst.msk [vmem:[#allocation2 + $0x89] sm:$0x1] %vm388_vm0, %v3187_v0  ;;  %s3944_s19 = smov (!%p336_p5, %s3173_s19), 1  ;;  %s3946_s26 = smov (!%p348_p7, %s3261_s26), 0 }
  0x11   : > { %405 = vst.msk [vmem:[#allocation2 + $0xa1] sm:$0x1] %vm388_vm0, %v3187_v0  ;;  %406 = vst.msk [vmem:[#allocation2 + $0xb9] sm:$0x1] %vm388_vm0, %v3187_v0  ;;  %s339_s27 = scalar_select %p338_p6, %s3256_s25, 15 }
  0x12   : > { %407 = vst.msk [vmem:[#allocation2 + $0xd1] sm:$0x1] %vm388_vm0, %v3187_v0  ;;  %408 = vst.msk [vmem:[#allocation2 + $0xe9] sm:$0x1] %vm388_vm0, %v3187_v0  ;;  %s2397_s28 = sshll.u32 %s3944_s19, 5  ;;  %s3948_s6 = smov (!%p365_p9, %s2584_s6), 15 }
  0x13   : > { %s2396_s29 = sshll.u32 %s339_s27, 1  ;;  %s3950_s26 = smov (!%p2401_p8, %s3946_s26), 15  ;;  %vm415_vm1 = vcmask (!%p2418_p11), 31744  }
  0x14   : > { %s342_s30 = sadd.s32 %s2397_s28, %s2396_s29  ;;  %s3952_s6 = smov (!%p365_p9, %s3948_s6), 15 }
  0x15   : > { %s2398_s7 = sshll.u32 %s342_s30, 3  ;;  %s2406_s11 = sshll.u32 %s3950_s26, 1 }
  0x16   : > { %s3295_s10 = scalar_lea.vmem %s3930_s0, %s2398_s7  ;;  %s356_s12 = sadd.s32 %s2406_s11, %s2397_s28 }
  0x17   : > { %s2413_s13 = sshll.u32 %s3952_s6, 1  ;;  %s2408_s14 = sshll.u32 %s356_s12, 3 }
  0x18   : > { %s373_s15 = sadd.s32 %s2413_s13, %s2397_s28  ;;  %s358_s25 = scalar_lea.vmem %s3922_s1, %s2408_s14 }
  0x19   : > { %s2415_s27 = sshll.u32 %s373_s15, 3  ;;  %s2416_s8 = sshll.u32 %s3944_s19, 1  ;;  %v413_v1 = vld [vmem:[%s358_s25] sm:$0xff] (!%p2418_p11)  ;;  %v414_v2 = vld [vmem:[%s358_s25 + $0x8] sm:$0xff] (!%p2418_p11) }
  0x1a   : > { %s375_s7 = scalar_lea.vmem %s3923_s2, %s2415_s27  ;;  %412 = sbr.rel (%p2418_p11) target bundleno = 33 (0x21), region = 44  ;;  %416 = vst.msk [vmem:[#allocation2 + $0x1] sm:$0xff] (!%p2418_p11), %vm415_vm1, %v413_v1  ;;  %417 = vst.msk [vmem:[#allocation2 + $0x9] sm:$0xff] (!%p2418_p11), %vm415_vm1, %v414_v2 }
  0x1b   : > { %s383_s9 = scalar_select %p382_p10, %s3169_s18, 1 }
  0x1d   : > { %s385_s0 = sadd.s32 %s2416_s8, %s383_s9 }
  0x1e   : > { %s2417_s24 = sshll.u32 %s385_s0, 3 }
  0x1f   : > { %s3309_s11 = scalar_lea.vmem %s3926_s5, %s2417_s24 }
  0x21 PF: > { %p2419_p12 = scmp.ne.s32.totalorder %s3169_s18, 0 }
  0x22   : > { %vm422_vm2 = vcmask (!%p2419_p12), 31744   ;;  %v3188_v3 = vmov (!%p2419_p12), 0.0  }
  0x23   : > { %421 = sbr.rel (%p2419_p12) target bundleno = 42 (0x2a), region = 48  ;;  %423 = vst.msk [vmem:[#allocation2 + $0x1] sm:$0xff] (!%p2419_p12), %vm422_vm2, %v3188_v3  ;;  %424 = vst.msk [vmem:[#allocation2 + $0x9] sm:$0xff] (!%p2419_p12), %vm422_vm2, %v3188_v3 }
  0x2a PF: > { %p2420_p13 = scmp.ge.s32.totalorder %s3169_s18, 1 }
  0x2b   : > { %v429_v4 = vld [vmem:[%s375_s7] sm:$0xff] (!%p2420_p13)  ;;  %vm432_vm3 = vcmask (!%p2420_p13), 31744   ;;  %v430_v5 = vld [vmem:[%s375_s7 + $0x8] sm:$0xff] (!%p2420_p13) }
  0x2c   : > { %428 = sbr.rel (%p2420_p13) target bundleno = 51 (0x33), region = 52  ;;  %433 = vst.msk [vmem:[#allocation2 + $0xd9] sm:$0xff] (!%p2420_p13), %vm432_vm3, %v429_v4  ;;  %434 = vst.msk [vmem:[#allocation2 + $0xe1] sm:$0xff] (!%p2420_p13), %vm432_vm3, %v430_v5 }
  0x33 PF: > { %p2421_p0 = scmp.ne.s32.totalorder %s3169_s18, 1 }
  0x34   : > { %vm440_vm4 = vcmask (!%p2421_p0), 31744   ;;  %v3189_v6 = vmov (!%p2421_p0), 0.0  }
  0x35   : > { %438 = sbr.rel (%p2421_p0) target bundleno = 60 (0x3c), region = 56  ;;  %441 = vst.msk [vmem:[#allocation2 + $0xd9] sm:$0xff] (!%p2421_p0), %vm440_vm4, %v3189_v6  ;;  %442 = vst.msk [vmem:[#allocation2 + $0xe1] sm:$0xff] (!%p2421_p0), %vm440_vm4, %v3189_v6 }
  0x3c PF: > { %v508_v7 = vld [vmem:[%s3924_s3 + $0x4] sm:$0xf]  ;;  %vm613_vm5 = vcmask 1043456   ;;  %vm460_vm6 = vcmask 31744   ;;  %v3320_v9 = vld [vmem:[#allocation2 + $0x8] sm:$0xff]  ;;  %vm540_vm7 = vcmask 1046528  }
  0x3d   : > { %v3318_v8 = vld [vmem:[#allocation2] sm:$0xff]  ;;  %2738 = vmatprep.subr.msk.mxu1 %vm613_vm5, %v508_v7  ;;  %v542_v11 = vrot.slane %v3320_v9, 1  ;;  %v479_v12 = vld [vmem:[#allocation2 + $0x10] sm:$0x3]  ;;  %v444_v17 = vld [vmem:[%s3295_s10 + $0x8] sm:$0xff]  ;;  %v944_v28 = vrot.slane %v3320_v9, 2 }
  0x3e   : > { %v541_v10 = vrot.slane %v3318_v8, 1  ;;  %v443_v13 = vld [vmem:[%s3295_s10] sm:$0xff]  ;;  %2739 = vmatpush3.msk.msra.mxu1 %vm613_vm5, %v508_v7  ;;  %v544_v14 = vrot.slane %v479_v12, 1  ;;  %v946_v15 = vrot.slane %v479_v12, 2  ;;  %v3330_v16 = vld [vmem:[%s3924_s3 + $0x10] sm:$0xf] }
  0x3f   : > { %461 = vst.msk [vmem:[#allocation2 + $0x19] sm:$0xff] %vm460_vm6, %v443_v13  ;;  %v445_v18 = vld [vmem:[%s3295_s10 + $0x10] sm:$0xff]  ;;  %2842 = vmatprep.subr.msk.mxu0 %vm613_vm5, %v3330_v16  ;;  %462 = vst.msk [vmem:[#allocation2 + $0x21] sm:$0xff] %vm460_vm6, %v444_v17  ;;  %v446_v21 = vld [vmem:[%s3295_s10 + $0x18] sm:$0xff]  ;;  %v943_v23 = vrot.slane %v3318_v8, 2  ;;  %vm942_vm8 = vcmask 1045504  }
  0x40   : > { %v543_v19 = vsel %vm540_vm7, %v541_v10, %v542_v11  ;;  %v3342_v20 = vld [vmem:[%s3924_s3 + $0x14] sm:$0xf]  ;;  %463 = vst.msk [vmem:[#allocation2 + $0x31] sm:$0xff] %vm460_vm6, %v445_v18  ;;  %v447_v22 = vld [vmem:[%s3295_s10 + $0x20] sm:$0xff]  ;;  %v545_v24 = vsel %vm540_vm7, %v542_v11, %v544_v14  ;;  %2843 = vmatpush3.msk.msra.mxu0 %vm613_vm5, %v3330_v16  ;;  %464 = vst.msk [vmem:[#allocation2 + $0x39] sm:$0xff] %vm460_vm6, %v446_v21  ;;  %v3378_v35 = vsel %vm942_vm8, %v944_v28, %v946_v15 }
  0x41   : > { %2740 = vmatprep.mubr.msk.f32.mxu1 %vm460_vm6, %v543_v19  ;;  %v448_v25 = vld [vmem:[%s3295_s10 + $0x28] sm:$0xff]  ;;  %465 = vst.msk [vmem:[#allocation2 + $0x49] sm:$0xff] %vm460_vm6, %v447_v22  ;;  %v449_v26 = vld [vmem:[%s3295_s10 + $0x30] sm:$0xff]  ;;  %v450_v27 = vld [vmem:[%s3295_s10 + $0x38] sm:$0xff]  ;;  %2868 = vmatprep.subr.msk.mxu0 %vm613_vm5, %v3342_v20  ;;  %v3375_v34 = vsel %vm942_vm8, %v943_v23, %v944_v28 }
  0x42   : > { %2741 = vmatmul.mubr.msk.f32.vlgmr.msra.gmra.mrb[0].mxu1 %vm460_vm6, %v545_v24  ;;  %466 = vst.msk [vmem:[#allocation2 + $0x51] sm:$0xff] %vm460_vm6, %v448_v25  ;;  %467 = vst.msk [vmem:[#allocation2 + $0x61] sm:$0xff] %vm460_vm6, %v449_v26  ;;  %v451_v29 = vld [vmem:[%s3295_s10 + $0x40] sm:$0xff]  ;;  %v452_v30 = vld [vmem:[%s3295_s10 + $0x48] sm:$0xff] }
  0x43   : > { %468 = vst.msk [vmem:[#allocation2 + $0x69] sm:$0xff] %vm460_vm6, %v450_v27  ;;  %v507_v31 = vld [vmem:[%s3924_s3] sm:$0xf]  ;;  %469 = vst.msk [vmem:[#allocation2 + $0x79] sm:$0xff] %vm460_vm6, %v451_v29  ;;  %v453_v32 = vld [vmem:[%s3295_s10 + $0x50] sm:$0xff] }
  0x44   : > { %470 = vst.msk [vmem:[#allocation2 + $0x81] sm:$0xff] %vm460_vm6, %v452_v30  ;;  %2764 = vmatprep.subr.msk.mxu1 %vm613_vm5, %v507_v31  ;;  %v454_v33 = vld [vmem:[%s3295_s10 + $0x58] sm:$0xff]  ;;  %471 = vst.msk [vmem:[#allocation2 + $0x91] sm:$0xff] %vm460_vm6, %v453_v32  ;;  %v455_v36 = vld [vmem:[%s3295_s10 + $0x60] sm:$0xff] }
  0x45   : > { %2765 = vmatpush3.msk.msra.mxu1 %vm613_vm5, %v507_v31  ;;  %472 = vst.msk [vmem:[#allocation2 + $0x99] sm:$0xff] %vm460_vm6, %v454_v33  ;;  %v456_v37 = vld [vmem:[%s3295_s10 + $0x68] sm:$0xff]  ;;  %v457_v38 = vld [vmem:[%s3295_s10 + $0x70] sm:$0xff]  ;;  %473 = vst.msk [vmem:[#allocation2 + $0xa9] sm:$0xff] %vm460_vm6, %v455_v36 }
  0x46   : > { %474 = vst.msk [vmem:[#allocation2 + $0xb1] sm:$0xff] %vm460_vm6, %v456_v37  ;;  %v458_v39 = vld [vmem:[%s3295_s10 + $0x78] sm:$0xff]  ;;  %475 = vst.msk [vmem:[#allocation2 + $0xc1] sm:$0xff] %vm460_vm6, %v457_v38  ;;  %v3393_v40 = vld [vmem:[%s3924_s3 + $0x8] sm:$0xf] }
  0x47   : > { %v3395_v41 = vld [vmem:[#allocation2 + $0x18] sm:$0xff]  ;;  %476 = vst.msk [vmem:[#allocation2 + $0xc9] sm:$0xff] %vm460_vm6, %v458_v39  ;;  %2790 = vmatprep.subr.msk.mxu1 %vm613_vm5, %v3393_v40  ;;  %v3400_v42 = vld [vmem:[#allocation2 + $0x20] sm:$0xff]  ;;  %v3403_v44 = vld [vmem:[#allocation2 + $0x28] sm:$0x3] }
  0x48   : > { %v546_v43 = vrot.slane %v3395_v41, 1  ;;  %v3405_v45 = vld [vmem:[#allocation2 + $0x30] sm:$0xff]  ;;  %v547_v46 = vrot.slane %v3400_v42, 1  ;;  %v549_v47 = vrot.slane %v3403_v44, 1  ;;  %v3409_v48 = vld [vmem:[#allocation2 + $0x38] sm:$0xff]  ;;  %v3412_v50 = vld [vmem:[#allocation2 + $0x48] sm:$0xff] }
  0x49   : > { %v551_v49 = vrot.slane %v3405_v45, 1  ;;  %v552_v51 = vrot.slane %v3409_v48, 1  ;;  %v3415_v52 = vld [vmem:[#allocation2 + $0x40] sm:$0x3]  ;;  %v3417_v53 = vld [vmem:[#allocation2 + $0x50] sm:$0xff]  ;;  %v556_v54 = vrot.slane %v3412_v50, 1 }
  0x4a   : > { %v548_v55 = vsel %vm540_vm7, %v546_v43, %v547_v46  ;;  %v550_v56 = vsel %vm540_vm7, %v547_v46, %v549_v47  ;;  %v554_v57 = vrot.slane %v3415_v52, 1  ;;  %v557_v58 = vrot.slane %v3417_v53, 1  ;;  %v3424_v59 = vld [vmem:[#allocation2 + $0x58] sm:$0x3]  ;;  %v3431_v61 = vld [vmem:[#allocation2 + $0x60] sm:$0xff]  ;;  %v3433_v62 = vld [vmem:[#allocation2 + $0x68] sm:$0xff] }
  0x4b   : > { %2743 = vmatprep.mubr.msk.f32.mxu1 %vm460_vm6, %v548_v55  ;;  %2844 = vmatprep.mubr.msk.f32.mxu0 %vm460_vm6, %v548_v55  ;;  %v3429_v60 = vsel %vm540_vm7, %v551_v49, %v552_v51  ;;  %v3438_v63 = vld [vmem:[%s3924_s3 + $0x18] sm:$0xf]  ;;  %v559_v1 = vrot.slane %v3424_v59, 1  ;;  %v561_v3 = vrot.slane %v3431_v61, 1  ;;  %v562_v4 = vrot.slane %v3433_v62, 1  ;;  %v3463_v7 = vld [vmem:[#allocation2 + $0x80] sm:$0xff] }
  0x4c   : > { %2744 = vmatmul.mubr.msk.f32.gmra.mrb[2].mxu1 %vm460_vm6, %v550_v56  ;;  %2845 = vmatmul.mubr.msk.f32.vlgmr.msra.gmra.mrb[0].mxu0 %vm460_vm6, %v550_v56  ;;  %v3447_v0 = vsel %vm540_vm7, %v552_v51, %v554_v57  ;;  %v3453_v2 = vsel %vm540_vm7, %v556_v54, %v557_v58  ;;  %v3457_v5 = vld [vmem:[#allocation2 + $0x70] sm:$0x3]  ;;  %v3459_v6 = vld [vmem:[#allocation2 + $0x78] sm:$0xff]  ;;  %v948_v13 = vrot.slane %v3395_v41, 2  ;;  %v567_v15 = vrot.slane %v3463_v7, 1  ;;  %v3515_v31 = vld [vmem:[#allocation2 + $0xa8] sm:$0xff] }
  0x4d   : > { %2869 = vmatpush3.msk.msra.mxu0 %vm613_vm5, %v3342_v20  ;;  %2746 = vmatprep.mubr.msk.f32.mxu1 %vm460_vm6, %v3429_v60  ;;  %v3474_v10 = vsel %vm540_vm7, %v557_v58, %v559_v1  ;;  %v564_v11 = vrot.slane %v3457_v5, 1  ;;  %v566_v12 = vrot.slane %v3459_v6, 1  ;;  %v3480_v14 = vsel %vm540_vm7, %v561_v3, %v562_v4  ;;  %v3484_v18 = vld [vmem:[#allocation2 + $0x88] sm:$0x3]  ;;  %v3486_v19 = vld [vmem:[#allocation2 + $0x90] sm:$0xff]  ;;  %v3488_v20 = vld [vmem:[#allocation2 + $0x98] sm:$0xff] }
  0x4e   : > { %2847 = vmatprep.mubr.msk.f32.mxu0 %vm460_vm6, %v3429_v60  ;;  %2894 = vmatprep.subr.msk.mxu0 %vm613_vm5, %v3438_v63  ;;  %v949_v17 = vrot.slane %v3400_v42, 2  ;;  %v951_v21 = vrot.slane %v3403_v44, 2  ;;  %v569_v23 = vrot.slane %v3484_v18, 1  ;;  %v571_v24 = vrot.slane %v3486_v19, 1  ;;  %v3505_v26 = vld [vmem:[#allocation2 + $0xa0] sm:$0x3] }
  0x4f   : > { %v3500_v22 = vsel %vm540_vm7, %v562_v4, %v564_v11  ;;  %v572_v25 = vrot.slane %v3488_v20, 1  ;;  %v3508_v27 = vsel %vm540_vm7, %v566_v12, %v567_v15  ;;  %v953_v29 = vrot.slane %v3405_v45, 2  ;;  %v3517_v32 = vld [vmem:[#allocation2 + $0xb0] sm:$0xff]  ;;  %v3542_v49 = vld [vmem:[#allocation2 + $0xb8] sm:$0x3] }
  0x50   : > { %2747 = vmatmul.mubr.msk.f32.gmra.mrb[4].mxu1 %vm460_vm6, %v3447_v0  ;;  %2848 = vmatmul.mubr.msk.f32.gmra.mrb[2].mxu0 %vm460_vm6, %v3447_v0  ;;  %v3511_v28 = vsel %vm942_vm8, %v948_v13, %v949_v17  ;;  %v954_v30 = vrot.slane %v3409_v48, 2  ;;  %v574_v33 = vrot.slane %v3505_v26, 1  ;;  %v3529_v36 = vsel %vm540_vm7, %v567_v15, %v569_v23  ;;  %v3550_v54 = vld [vmem:[%s3924_s3 + $0x1c] sm:$0xf] }
  0x51   : > { %2749 = vmatprep.mubr.msk.f32.mxu1 %vm460_vm6, %v3453_v2  ;;  %2850 = vmatprep.mubr.msk.f32.mxu0 %vm460_vm6, %v3453_v2  ;;  %v3532_v37 = vsel %vm942_vm8, %v949_v17, %v951_v21  ;;  %v3535_v38 = vsel %vm540_vm7, %v571_v24, %v572_v25  ;;  %v956_v39 = vrot.slane %v3415_v52, 2  ;;  %v576_v43 = vrot.slane %v3515_v31, 1 }
  0x52   : > { %v577_v44 = vrot.slane %v3517_v32, 1  ;;  %v958_v46 = vrot.slane %v3412_v50, 2  ;;  %v959_v47 = vrot.slane %v3417_v53, 2  ;;  %v3545_v51 = vsel %vm942_vm8, %v953_v29, %v954_v30 }
  0x53   : > { %v3557_v52 = vsel %vm540_vm7, %v572_v25, %v574_v33  ;;  %v3564_v55 = vsel %vm942_vm8, %v954_v30, %v956_v39  ;;  %v579_v56 = vrot.slane %v3542_v49, 1  ;;  %v961_v57 = vrot.slane %v3424_v59, 2  ;;  %v2245_v59 = vld [vmem:[%s3925_s4] sm:$0xff] }
  0x54   : > { %2750 = vmatmul.mubr.msk.f32.gmra.mrb[6].mxu1 %vm460_vm6, %v3474_v10  ;;  %2851 = vmatmul.mubr.msk.f32.gmra.mrb[4].mxu0 %vm460_vm6, %v3474_v10  ;;  %v3571_v58 = vsel %vm540_vm7, %v576_v43, %v577_v44  ;;  %v3574_v1 = vsel %vm942_vm8, %v958_v46, %v959_v47  ;;  %v964_v3 = vrot.slane %v3433_v62, 2  ;;  %v3190_v4 = vmov 0   ;;  %v3642_v43 = vld [vmem:[#allocation2 + $0xc0] sm:$0xff] }
  0x55   : > { %2752 = vmatprep.mubr.msk.f32.mxu1 %vm460_vm6, %v3480_v14  ;;  %2853 = vmatprep.mubr.msk.f32.mxu0 %vm460_vm6, %v3480_v14  ;;  %v3592_v11 = vsel %vm540_vm7, %v577_v44, %v579_v56  ;;  %v3595_v12 = vsel %vm942_vm8, %v959_v47, %v961_v57  ;;  %v966_v13 = vrot.slane %v3457_v5, 2  ;;  %v968_v17 = vrot.slane %v3459_v6, 2  ;;  %v3644_v44 = vld [vmem:[#allocation2 + $0xc8] sm:$0xff]  ;;  %v3664_v57 = vld [vmem:[#allocation2 + $0xd0] sm:$0x3] }
  0x56   : > { %3146 = vset.pattern.permute.xlu0 %v3190_v4  ;;  %v969_v21 = vrot.slane %v3463_v7, 2  ;;  %v971_v23 = vrot.slane %v3484_v18, 2  ;;  %v973_v25 = vrot.slane %v3486_v19, 2  ;;  %v974_v29 = vrot.slane %v3488_v20, 2 }
  0x57   : > { %2248 = vperm.xlu0 %3146, %v2245_v59   ;;  %v3612_v5 = vsel %vm942_vm8, %v964_v3, %v966_v13  ;;  %v976_v30 = vrot.slane %v3505_v26, 2  ;;  %v978_v33 = vrot.slane %v3515_v31, 2  ;;  %v979_v39 = vrot.slane %v3517_v32, 2  ;;  %v515_v59 = vld [vmem:[%s3924_s3 + $0x20] sm:$0xf] }
  0x58   : > { %2753 = vmatmul.mubr.msk.f32.gmra.mrb[8].mxu1 %vm460_vm6, %v3500_v22  ;;  %2854 = vmatmul.mubr.msk.f32.gmra.mrb[6].mxu0 %vm460_vm6, %v3500_v22  ;;  %v3616_v24 = vsel %vm942_vm8, %v968_v17, %v969_v21  ;;  %v3632_v18 = vsel %vm942_vm8, %v969_v21, %v971_v23  ;;  %v981_v26 = vrot.slane %v3542_v49, 2  ;;  %v1523_v47 = vrot.slane %v3642_v43, 2 }
  0x59   : > { %2755 = vmatprep.mubr.msk.f32.mxu1 %vm460_vm6, %v3508_v27  ;;  %2870 = vmatprep.mubr.msk.f32.mxu0 %vm460_vm6, %v3511_v28  ;;  %v3660_v46 = vsel %vm942_vm8, %v978_v33, %v979_v39  ;;  %v1524_v56 = vrot.slane %v3644_v44, 2 }
  0x5a   : > { %v3675_v49 = vsel %vm942_vm8, %v979_v39, %v981_v26 }
  0x5c   : > { %2756 = vmatmul.mubr.msk.f32.gmra.mrb[10].mxu1 %vm460_vm6, %v3529_v36  ;;  %2871 = vmatmul.mubr.msk.f32.vlgmr.msra.gmra.mrb[0].mxu0 %vm460_vm6, %v3532_v37 }
  0x5d   : > { %2895 = vmatpush3.msk.msra.mxu0 %vm613_vm5, %v3438_v63  ;;  %2758 = vmatprep.mubr.msk.f32.mxu1 %vm460_vm6, %v3535_v38  ;;  %v963_v63 = vrot.slane %v3431_v61, 2 }
  0x5e   : > { %2873 = vmatprep.mubr.msk.f32.mxu0 %vm460_vm6, %v3545_v51  ;;  %2920 = vmatprep.subr.msk.mxu0 %vm613_vm5, %v3550_v54 }
  0x5f   : > { %v3599_v15 = vsel %vm942_vm8, %v963_v63, %v964_v3  ;;  %v1526_v63 = vrot.slane %v3664_v57, 2  ;;  %v3679_v3 = vsel %vm942_vm8, %v1523_v47, %v1524_v56 }
  0x60   : > { %2759 = vmatmul.mubr.msk.f32.gmra.mrb[12].mxu1 %vm460_vm6, %v3557_v52  ;;  %2874 = vmatmul.mubr.msk.f32.gmra.mrb[2].mxu0 %vm460_vm6, %v3564_v55 }
  0x61   : > { %2761 = vmatprep.mubr.msk.f32.mxu1 %vm460_vm6, %v3571_v58  ;;  %2876 = vmatprep.mubr.msk.f32.mxu0 %vm460_vm6, %v3574_v1  ;;  %v3690_v4 = vsel %vm942_vm8, %v1524_v56, %v1526_v63 }
  0x64   : > { %2762 = vmatmul.mubr.msk.f32.gmra.mrb[14].mxu1 %vm460_vm6, %v3592_v11  ;;  %2877 = vmatmul.mubr.msk.f32.gmra.mrb[4].mxu0 %vm460_vm6, %v3595_v12 }
  0x65   : > { %2766 = vmatprep.mubr.msk.f32.mxu1 %vm460_vm6, %v3318_v8  ;;  %2879 = vmatprep.mubr.msk.f32.mxu0 %vm460_vm6, %v3599_v15  ;;  %v510_v8 = vld [vmem:[%s3924_s3 + $0xc] sm:$0xf] }
  0x68   : > { %2767 = vmatmul.mubr.msk.f32.vlgmr.msra.gmra.mrb[0].mxu1 %vm460_vm6, %v3320_v9  ;;  %2880 = vmatmul.mubr.msk.f32.gmra.mrb[6].mxu0 %vm460_vm6, %v3612_v5  ;;  %v3636_v9 = vsel %vm942_vm8, %v973_v25, %v974_v29 }
  0x69   : > { %2769 = vmatprep.mubr.msk.f32.mxu1 %vm460_vm6, %v3395_v41  ;;  %2882 = vmatprep.mubr.msk.f32.mxu0 %vm460_vm6, %v3616_v24 }
  0x6a   : > { %2791 = vmatpush3.msk.msra.mxu1 %vm613_vm5, %v3393_v40  ;;  %v3656_v40 = vsel %vm942_vm8, %v974_v29, %v976_v30 }
  0x6b   : > { %2816 = vmatprep.subr.msk.mxu1 %vm613_vm5, %v510_v8 }
  0x6c   : > { %2770 = vmatmul.mubr.msk.f32.gmra.mrb[2].mxu1 %vm460_vm6, %v3400_v42  ;;  %2883 = vmatmul.mubr.msk.f32.gmra.mrb[8].mxu0 %vm460_vm6, %v3632_v18 }
  0x6d   : > { %2772 = vmatprep.mubr.msk.f32.mxu1 %vm460_vm6, %v3405_v45  ;;  %2885 = vmatprep.mubr.msk.f32.mxu0 %vm460_vm6, %v3636_v9 }
  0x70   : > { %2773 = vmatmul.mubr.msk.f32.gmra.mrb[4].mxu1 %vm460_vm6, %v3409_v48  ;;  %2886 = vmatmul.mubr.msk.f32.gmra.mrb[10].mxu0 %vm460_vm6, %v3656_v40 }
  0x71   : > { %2775 = vmatprep.mubr.msk.f32.mxu1 %vm460_vm6, %v3412_v50  ;;  %2888 = vmatprep.mubr.msk.f32.mxu0 %vm460_vm6, %v3660_v46 }
  0x74   : > { %2776 = vmatmul.mubr.msk.f32.gmra.mrb[6].mxu1 %vm460_vm6, %v3417_v53  ;;  %2889 = vmatmul.mubr.msk.f32.gmra.mrb[12].mxu0 %vm460_vm6, %v3675_v49 }
  0x75   : > { %2778 = vmatprep.mubr.msk.f32.mxu1 %vm460_vm6, %v3431_v61  ;;  %2891 = vmatprep.mubr.msk.f32.mxu0 %vm460_vm6, %v3679_v3 }
  0x78   : > { %2779 = vmatmul.mubr.msk.f32.gmra.mrb[8].mxu1 %vm460_vm6, %v3433_v62  ;;  %2892 = vmatmul.mubr.msk.f32.gmra.mrb[14].mxu0 %vm460_vm6, %v3690_v4 }
  0x79   : > { %2781 = vmatprep.mubr.msk.f32.mxu1 %vm460_vm6, %v3459_v6  ;;  %2896 = vmatprep.mubr.msk.f32.mxu0 %vm460_vm6, %v3405_v45 }
  0x7c   : > { %2782 = vmatmul.mubr.msk.f32.gmra.mrb[10].mxu1 %vm460_vm6, %v3463_v7  ;;  %2897 = vmatmul.mubr.msk.f32.vlgmr.msra.gmra.mrb[0].mxu0 %vm460_vm6, %v3409_v48 }
  0x7d   : > { %2921 = vmatpush3.msk.msra.mxu0 %vm613_vm5, %v3550_v54  ;;  %2784 = vmatprep.mubr.msk.f32.mxu1 %vm460_vm6, %v3486_v19 }
  0x7e   : > { %2899 = vmatprep.mubr.msk.f32.mxu0 %vm460_vm6, %v3412_v50  ;;  %2946 = vmatprep.subr.msk.mxu0 %vm613_vm5, %v515_v59 }
  0x80   : > { %2785 = vmatmul.mubr.msk.f32.gmra.mrb[12].mxu1 %vm460_vm6, %v3488_v20  ;;  %2900 = vmatmul.mubr.msk.f32.gmra.mrb[2].mxu0 %vm460_vm6, %v3417_v53 }
  0x81   : > { %2787 = vmatprep.mubr.msk.f32.mxu1 %vm460_vm6, %v3515_v31  ;;  %2902 = vmatprep.mubr.msk.f32.mxu0 %vm460_vm6, %v3431_v61 }
  0x84   : > { %2788 = vmatmul.mubr.msk.f32.gmra.mrb[14].mxu1 %vm460_vm6, %v3517_v32  ;;  %2903 = vmatmul.mubr.msk.f32.gmra.mrb[4].mxu0 %vm460_vm6, %v3433_v62 }
  0x85   : > { %2792 = vmatprep.mubr.msk.f32.mxu1 %vm460_vm6, %v3375_v34  ;;  %2905 = vmatprep.mubr.msk.f32.mxu0 %vm460_vm6, %v3459_v6  ;;  %v3757_v34 = vld [vmem:[#allocation2 + $0xd8] sm:$0xff] }
  0x88   : > { %2793 = vmatmul.mubr.msk.f32.vlgmr.msra.gmra.mrb[0].mxu1 %vm460_vm6, %v3378_v35  ;;  %2906 = vmatmul.mubr.msk.f32.gmra.mrb[6].mxu0 %vm460_vm6, %v3463_v7  ;;  %v3767_v35 = vld [vmem:[#allocation2 + $0xe0] sm:$0xff] }
  0x89   : > { %2795 = vmatprep.mubr.msk.f32.mxu1 %vm460_vm6, %v3511_v28  ;;  %2908 = vmatprep.mubr.msk.f32.mxu0 %vm460_vm6, %v3486_v19 }
  0x8a   : > { %2817 = vmatpush3.msk.msra.mxu1 %vm613_vm5, %v510_v8 }
  0x8b   : > { %2972 = vmatprep.subr.msk.mxu1 %vm613_vm5, %v3330_v16 }
  0x8c   : > { %2796 = vmatmul.mubr.msk.f32.gmra.mrb[2].mxu1 %vm460_vm6, %v3532_v37  ;;  %2909 = vmatmul.mubr.msk.f32.gmra.mrb[8].mxu0 %vm460_vm6, %v3488_v20 }
  0x8d   : > { %2798 = vmatprep.mubr.msk.f32.mxu1 %vm460_vm6, %v3545_v51  ;;  %2911 = vmatprep.mubr.msk.f32.mxu0 %vm460_vm6, %v3515_v31 }
  0x90   : > { %2799 = vmatmul.mubr.msk.f32.gmra.mrb[4].mxu1 %vm460_vm6, %v3564_v55  ;;  %2912 = vmatmul.mubr.msk.f32.gmra.mrb[10].mxu0 %vm460_vm6, %v3517_v32 }
  0x91   : > { %2801 = vmatprep.mubr.msk.f32.mxu1 %vm460_vm6, %v3574_v1  ;;  %2914 = vmatprep.mubr.msk.f32.mxu0 %vm460_vm6, %v3642_v43 }
  0x94   : > { %2802 = vmatmul.mubr.msk.f32.gmra.mrb[6].mxu1 %vm460_vm6, %v3595_v12  ;;  %2915 = vmatmul.mubr.msk.f32.gmra.mrb[12].mxu0 %vm460_vm6, %v3644_v44 }
  0x95   : > { %2804 = vmatprep.mubr.msk.f32.mxu1 %vm460_vm6, %v3599_v15  ;;  %2917 = vmatprep.mubr.msk.f32.mxu0 %vm460_vm6, %v3757_v34 }
  0x98   : > { %2805 = vmatmul.mubr.msk.f32.gmra.mrb[8].mxu1 %vm460_vm6, %v3612_v5  ;;  %2918 = vmatmul.mubr.msk.f32.gmra.mrb[14].mxu0 %vm460_vm6, %v3767_v35 }
  0x99   : > { %2807 = vmatprep.mubr.msk.f32.mxu1 %vm460_vm6, %v3616_v24  ;;  %2922 = vmatprep.mubr.msk.f32.mxu0 %vm460_vm6, %v3429_v60  ;;  %v1350_v60 = vrot.slane %v3642_v43, 1 }
  0x9c   : > { %2808 = vmatmul.mubr.msk.f32.gmra.mrb[10].mxu1 %vm460_vm6, %v3632_v18  ;;  %2923 = vmatmul.mubr.msk.f32.vlgmr.msra.gmra.mrb[0].mxu0 %vm460_vm6, %v3447_v0  ;;  %v1351_v0 = vrot.slane %v3644_v44, 1 }
  0x9d   : > { %2947 = vmatpush3.msk.msra.mxu0 %vm613_vm5, %v515_v59  ;;  %2810 = vmatprep.mubr.msk.f32.mxu1 %vm460_vm6, %v3636_v9 }
  0x9e   : > { %2925 = vmatprep.mubr.msk.f32.mxu0 %vm460_vm6, %v3453_v2  ;;  %v506_v2 = vld [vmem:[#allocation2 + $0xe8] sm:$0x3] }
  0xa0   : > { %2811 = vmatmul.mubr.msk.f32.gmra.mrb[12].mxu1 %vm460_vm6, %v3656_v40  ;;  %2926 = vmatmul.mubr.msk.f32.gmra.mrb[2].mxu0 %vm460_vm6, %v3474_v10 }
  0xa1   : > { %2813 = vmatprep.mubr.msk.f32.mxu1 %vm460_vm6, %v3660_v46  ;;  %2928 = vmatprep.mubr.msk.f32.mxu0 %vm460_vm6, %v3480_v14 }
  0xa4   : > { %2814 = vmatmul.mubr.msk.f32.gmra.mrb[14].mxu1 %vm460_vm6, %v3675_v49  ;;  %2929 = vmatmul.mubr.msk.f32.gmra.mrb[4].mxu0 %vm460_vm6, %v3500_v22 }
  0xa5   : > { %2818 = vmatprep.mubr.msk.f32.mxu1 %vm460_vm6, %v3395_v41  ;;  %2931 = vmatprep.mubr.msk.f32.mxu0 %vm460_vm6, %v3508_v27  ;;  %v1353_v41 = vrot.slane %v3664_v57, 1 }
  0xa8   : > { %2819 = vmatmul.mubr.msk.f32.vlgmr.msra.gmra.mrb[0].mxu1 %vm460_vm6, %v3400_v42  ;;  %2932 = vmatmul.mubr.msk.f32.gmra.mrb[6].mxu0 %vm460_vm6, %v3529_v36  ;;  %v1867_v42 = vrot.slane %v3757_v34, 1 }
  0xa9   : > { %2821 = vmatprep.mubr.msk.f32.mxu1 %vm460_vm6, %v3405_v45  ;;  %2934 = vmatprep.mubr.msk.f32.mxu0 %vm460_vm6, %v3535_v38  ;;  %v1868_v45 = vrot.slane %v3767_v35, 1 }
  0xaa   : > { %2973 = vmatpush3.msk.msra.mxu1 %vm613_vm5, %v3330_v16  ;;  %v1352_v16 = vsel %vm540_vm7, %v1350_v60, %v1351_v0 }
  0xab   : > { %v1869_v10 = vsel %vm540_vm7, %v1867_v42, %v1868_v45 }
  0xac   : > { %2822 = vmatmul.mubr.msk.f32.gmra.mrb[2].mxu1 %vm460_vm6, %v3409_v48  ;;  %2935 = vmatmul.mubr.msk.f32.gmra.mrb[8].mxu0 %vm460_vm6, %v3557_v52  ;;  %v1354_v48 = vsel %vm540_vm7, %v1351_v0, %v1353_v41 }
  0xad   : > { %2824 = vmatprep.mubr.msk.f32.mxu1 %vm460_vm6, %v3412_v50  ;;  %2937 = vmatprep.mubr.msk.f32.mxu0 %vm460_vm6, %v3571_v58  ;;  %v1870_v50 = vrot.slane %v506_v2, 1 }
  0xb0   : > { %2825 = vmatmul.mubr.msk.f32.gmra.mrb[4].mxu1 %vm460_vm6, %v3417_v53  ;;  %2938 = vmatmul.mubr.msk.f32.gmra.mrb[10].mxu0 %vm460_vm6, %v3592_v11  ;;  %v1871_v53 = vsel %vm540_vm7, %v1868_v45, %v1870_v50 }
  0xb1   : > { %2827 = vmatprep.mubr.msk.f32.mxu1 %vm460_vm6, %v3431_v61  ;;  %2940 = vmatprep.mubr.msk.f32.mxu0 %vm460_vm6, %v1352_v16  ;;  %v2040_v61 = vrot.slane %v3757_v34, 2 }
  0xb4   : > { %2828 = vmatmul.mubr.msk.f32.gmra.mrb[6].mxu1 %vm460_vm6, %v3433_v62  ;;  %2941 = vmatmul.mubr.msk.f32.gmra.mrb[12].mxu0 %vm460_vm6, %v1354_v48  ;;  %v2041_v62 = vrot.slane %v3767_v35, 2 }
  0xb5   : > { %2830 = vmatprep.mubr.msk.f32.mxu1 %vm460_vm6, %v3459_v6  ;;  %2943 = vmatprep.mubr.msk.f32.mxu0 %vm460_vm6, %v1869_v10  ;;  %v2043_v6 = vrot.slane %v506_v2, 2 }
  0xb7   : > { %v2044_v14 = vsel %vm942_vm8, %v2041_v62, %v2043_v6 }
  0xb8   : > { %2831 = vmatmul.mubr.msk.f32.gmra.mrb[8].mxu1 %vm460_vm6, %v3463_v7  ;;  %2944 = vmatmul.mubr.msk.f32.gmra.mrb[14].mxu0 %vm460_vm6, %v1871_v53  ;;  %v2042_v7 = vsel %vm942_vm8, %v2040_v61, %v2041_v62 }
  0xb9   : > { %2833 = vmatprep.mubr.msk.f32.mxu1 %vm460_vm6, %v3486_v19  ;;  %2948 = vmatprep.mubr.msk.f32.mxu0 %vm460_vm6, %v3545_v51 }
  0xbc   : > { %2834 = vmatmul.mubr.msk.f32.gmra.mrb[10].mxu1 %vm460_vm6, %v3488_v20  ;;  %2949 = vmatmul.mubr.msk.f32.vlgmr.msra.gmra.mrb[0].mxu0 %vm460_vm6, %v3564_v55 }
  0xbd   : > { %2836 = vmatprep.mubr.msk.f32.mxu1 %vm460_vm6, %v3515_v31  ;;  %2951 = vmatprep.mubr.msk.f32.mxu0 %vm460_vm6, %v3574_v1 }
  0xc0   : > { %2837 = vmatmul.mubr.msk.f32.gmra.mrb[12].mxu1 %vm460_vm6, %v3517_v32  ;;  %2952 = vmatmul.mubr.msk.f32.gmra.mrb[2].mxu0 %vm460_vm6, %v3595_v12 }
  0xc1   : > { %2839 = vmatprep.mubr.msk.f32.mxu1 %vm460_vm6, %v3642_v43  ;;  %2954 = vmatprep.mubr.msk.f32.mxu0 %vm460_vm6, %v3599_v15 }
  0xc4   : > { %2840 = vmatmul.mubr.msk.f32.gmra.mrb[14].mxu1 %vm460_vm6, %v3644_v44  ;;  %2955 = vmatmul.mubr.msk.f32.gmra.mrb[4].mxu0 %vm460_vm6, %v3612_v5 }
  0xc5   : > { %2856 = vmatprep.mubr.msk.f32.mxu1 %vm460_vm6, %v3508_v27  ;;  %2957 = vmatprep.mubr.msk.f32.mxu0 %vm460_vm6, %v3616_v24 }
  0xc8   : > { %2857 = vmatmul.mubr.msk.f32.vlgmr.msra.gmra.mrb[8].mxu1 %vm460_vm6, %v3529_v36  ;;  %2958 = vmatmul.mubr.msk.f32.gmra.mrb[6].mxu0 %vm460_vm6, %v3632_v18 }
  0xc9   : > { %2859 = vmatprep.mubr.msk.f32.mxu1 %vm460_vm6, %v3535_v38  ;;  %2960 = vmatprep.mubr.msk.f32.mxu0 %vm460_vm6, %v3636_v9 }
  0xcc   : > { %2860 = vmatmul.mubr.msk.f32.gmra.mrb[10].mxu1 %vm460_vm6, %v3557_v52  ;;  %2961 = vmatmul.mubr.msk.f32.gmra.mrb[8].mxu0 %vm460_vm6, %v3656_v40 }
  0xcd   : > { %2862 = vmatprep.mubr.msk.f32.mxu1 %vm460_vm6, %v3571_v58  ;;  %2963 = vmatprep.mubr.msk.f32.mxu0 %vm460_vm6, %v3660_v46 }
  0xd0   : > { %2863 = vmatmul.mubr.msk.f32.gmra.mrb[12].mxu1 %vm460_vm6, %v3592_v11  ;;  %2964 = vmatmul.mubr.msk.f32.gmra.mrb[10].mxu0 %vm460_vm6, %v3675_v49 }
  0xd1   : > { %2865 = vmatprep.mubr.msk.f32.mxu1 %vm460_vm6, %v1352_v16  ;;  %2966 = vmatprep.mubr.msk.f32.mxu0 %vm460_vm6, %v3679_v3 }
  0xd4   : > { %2866 = vmatmul.mubr.msk.f32.gmra.mrb[14].mxu1 %vm460_vm6, %v1354_v48  ;;  %2967 = vmatmul.mubr.msk.f32.gmra.mrb[12].mxu0 %vm460_vm6, %v3690_v4 }
  0xd5   : > { %2969 = vmatprep.mubr.msk.f32.mxu0 %vm460_vm6, %v2042_v7 }
  0xd6   : > { %v2249_v60 = vpop.permute.xlu0 %2248 }
  0xd8   : > { %2970 = vmatmul.mubr.msk.f32.gmra.mrb[14].mxu0 %vm460_vm6, %v2044_v14 }
 0x17b   : > { %v2820_v19 = vpop.f32.mrb[0].mxu1 }
 0x17c   : > { %v1254_v20 = vpop.f32.mrb[1].mxu1 }
 0x17f   : > { %v2823_v22 = vpop.f32.mrb[2].mxu1 }
 0x180   : > { %v1264_v27 = vpop.f32.mrb[3].mxu1 }
 0x183   : > { %v2826_v28 = vpop.f32.mrb[4].mxu1 }
 0x184   : > { %v1274_v31 = vpop.f32.mrb[5].mxu1 }
 0x187   : > { %v2829_v32 = vpop.f32.mrb[6].mxu1 }
 0x188   : > { %v1284_v36 = vpop.f32.mrb[7].mxu1 }
 0x18f   : > { %v2950_v37 = vpop.f32.mrb[0].mxu0 }
 0x190   : > { %v2974_v38 = vadd.f32 %v2950_v37, %v2820_v19  ;;  %v2118_v51 = vpop.f32.mrb[1].mxu0 }
 0x191   : > { %v2975_v54 = vadd.f32 %v2118_v51, %v1254_v20 }
 0x193   : > { %v2953_v52 = vpop.f32.mrb[2].mxu0  ;;  %2213 = vxpose.xlu0.b32.start [1/16] (narrow) %v2975_v54, 8 }
 0x194   : > { %v2976_v55 = vadd.f32 %v2953_v52, %v2823_v22  ;;  %v2128_v58 = vpop.f32.mrb[3].mxu0 }
 0x195   : > { %v2977_v1 = vadd.f32 %v2128_v58, %v1264_v27 }
 0x197   : > { %v2956_v11 = vpop.f32.mrb[4].mxu0  ;;  %2214 = vxpose.xlu0.b32.cont [2/16] (narrow) %v2974_v38, 8 }
 0x198   : > { %v2978_v12 = vadd.f32 %v2956_v11, %v2826_v28  ;;  %v2138_v13 = vpop.f32.mrb[5].mxu0 }
 0x199   : > { %v2979_v15 = vadd.f32 %v2138_v13, %v1274_v31 }
 0x19b   : > { %v2959_v17 = vpop.f32.mrb[6].mxu0  ;;  %2215 = vxpose.xlu0.b32.cont [3/16] (narrow) %v2977_v1, 8  ;;  %v2858_v21 = vpop.f32.mrb[8].mxu1 }
 0x19c   : > { %v2980_v5 = vadd.f32 %v2959_v17, %v2829_v32  ;;  %v1468_v23 = vpop.f32.mrb[9].mxu1  ;;  %v2148_v24 = vpop.f32.mrb[7].mxu0 }
 0x19d   : > { %v2981_v25 = vadd.f32 %v2148_v24, %v1284_v36 }
 0x19f   : > { %v2962_v29 = vpop.f32.mrb[8].mxu0  ;;  %2216 = vxpose.xlu0.b32.cont [4/16] (narrow) %v2976_v55, 8  ;;  %v2861_v8 = vpop.f32.mrb[10].mxu1 }
 0x1a0   : > { %v2982_v18 = vadd.f32 %v2962_v29, %v2858_v21  ;;  %v1478_v30 = vpop.f32.mrb[11].mxu1  ;;  %v2158_v9 = vpop.f32.mrb[9].mxu0 }
 0x1a1   : > { %v2983_v33 = vadd.f32 %v2158_v9, %v1468_v23 }
 0x1a3   : > { %v2965_v39 = vpop.f32.mrb[10].mxu0  ;;  %2217 = vxpose.xlu0.b32.cont [5/16] (narrow) %v2979_v15, 8  ;;  %v2864_v43 = vpop.f32.mrb[12].mxu1 }
 0x1a4   : > { %v2984_v44 = vadd.f32 %v2965_v39, %v2861_v8  ;;  %v1488_v40 = vpop.f32.mrb[13].mxu1  ;;  %v2168_v26 = vpop.f32.mrb[11].mxu0 }
 0x1a5   : > { %v2985_v46 = vadd.f32 %v2168_v26, %v1478_v30 }
 0x1a7   : > { %v2968_v47 = vpop.f32.mrb[12].mxu0  ;;  %2218 = vxpose.xlu0.b32.cont [6/16] (narrow) %v2978_v12, 8  ;;  %v2867_v56 = vpop.f32.mrb[14].mxu1 }
 0x1a8   : > { %v2986_v57 = vadd.f32 %v2968_v47, %v2864_v43  ;;  %v1498_v49 = vpop.f32.mrb[15].mxu1  ;;  %v2178_v63 = vpop.f32.mrb[13].mxu0 }
 0x1a9   : > { %v2987_v3 = vadd.f32 %v2178_v63, %v1488_v40 }
 0x1ab   : > { %v2971_v4 = vpop.f32.mrb[14].mxu0  ;;  %2219 = vxpose.xlu0.b32.cont [7/16] (narrow) %v2981_v25, 8 }
 0x1ac   : > { %v2988_v59 = vadd.f32 %v2971_v4, %v2867_v56  ;;  %v2188_v34 = vpop.f32.mrb[15].mxu0 }
 0x1ad   : > { %v2989_v35 = vadd.f32 %v2188_v34, %v1498_v49 }
 0x1af   : > { %2220 = vxpose.xlu0.b32.cont [8/16] (narrow) %v2980_v5, 8 }
 0x1b3   : > { %2221 = vxpose.xlu0.b32.cont [9/16] (narrow) %v2983_v33, 8 }
 0x1b7   : > { %2222 = vxpose.xlu0.b32.cont [10/16] (narrow) %v2982_v18, 8 }
 0x1bb   : > { %2223 = vxpose.xlu0.b32.cont [11/16] (narrow) %v2985_v46, 8 }
 0x1bf   : > { %2224 = vxpose.xlu0.b32.cont [12/16] (narrow) %v2984_v44, 8 }
 0x1c3   : > { %2225 = vxpose.xlu0.b32.cont [13/16] (narrow) %v2987_v3, 8 }
 0x1c7   : > { %2226 = vxpose.xlu0.b32.cont [14/16] (narrow) %v2986_v57, 8 }
 0x1cb   : > { %2227 = vxpose.xlu0.b32.cont [15/16] (narrow) %v2989_v35, 8 }
 0x1cf   : > { %2228 = vxpose.xlu0.b32.end [16/16] (narrow) %v2988_v59, 8 }
 0x213   : > { %v2229_v0 = vpop.trf.xlu0 }
 0x214   : > { %v2251_v41 = vadd.f32 %v2249_v60, %v2229_v0 }
 0x216   : > { %2252 = vst [vmem:[%s3309_s11] sm:$0xff] %v2251_v41 }
 0x217 PF: > { %s15_s22 = sadd.s32 1, %s3185_s22   ;;  %s3931_s9 = sld [smem:[#allocation3_spill]] }
 0x218   : > { %p12_p1 = scmp.ge.s32.totalorder %s15_s22, 6   ;;  %s3932_s26 = sld [smem:[#allocation4_spill]] }
 0x219   : > { %s3933_s18 = smov %s3177_s20  ;;  %s3934_s19 = smov %s3181_s21 }
 0x21a   :  { %14 = sbr.rel (!%p12_p1) target bundleno = 3 (0x3), region = 95 }
 0x21d   : > { %s3935_s20 = smov %s3931_s9 }
 0x21e   : > { %s3936_s21 = smov %s3932_s26 }

</bundles_post_ra>
